<compile_context>
chip_gen: v7x
topology: tpu7x:2x2x1
jax: 0.10.0
libtpu: 0.0.40
codegen_flags: <defaults>
</compile_context>

<pallas_src>
import functools

import jax
import jax.numpy as jnp
from jax.experimental import pallas as pl
from jax.experimental.pallas import tpu as pltpu


def _round_up(x, m):
    return ((x + m - 1) // m) * m


def _cdiv(a, b):
    return (a + b - 1) // b


def _device_config():
    """Per-generation tile caps / granules / scoped-VMEM limit."""
    try:
        kind = jax.devices()[0].device_kind.lower()
    except Exception:  # pragma: no cover - defensive
        kind = ""
    if "v7" in kind:
        # v7x: 64 MiB physical VMEM, 2 TensorCores.  (512,512,1024) f32 tiles
        # are ~11 MiB double-buffered -> comfortably under a 32 MiB limit.
        return dict(tm_cap=512, tn_cap=512, tk_cap=1024, n_gran=256, k_gran=256,
                    vmem_limit=32 * 1024 * 1024, two_cores=True)
    if "v6" in kind:
        return dict(tm_cap=512, tn_cap=512, tk_cap=1024, n_gran=256, k_gran=256,
                    vmem_limit=64 * 1024 * 1024, two_cores=False)
    # v5e / unknown: same caps; explicit limit beats the 16 MiB scoped default.
    return dict(tm_cap=512, tn_cap=512, tk_cap=1024, n_gran=128, k_gran=128,
                vmem_limit=64 * 1024 * 1024, two_cores=False)


def _balanced_tile(dim, cap, base, preferred):
    """Tile size for `dim`.

    If dim <= cap, return `dim` itself (full-extent blocks are exempt from the
    (8,128) divisibility rule -> zero padding).  Otherwise split into
    ceil(dim/cap) balanced blocks (minimizes padding waste vs. min(cap, ...)),
    rounded to `base`, and bumped to the MXU-`preferred` granule only when that
    does not increase the padded extent.
    """
    if dim <= cap:
        return dim
    n_blocks = _cdiv(dim, cap)
    t = _round_up(_cdiv(dim, n_blocks), base)
    tp = _round_up(t, preferred)
    if tp <= cap and _round_up(dim, tp) == _round_up(dim, t):
        t = tp
    return t


# ---------------------------------------------------------------------------
# Kernels
# ---------------------------------------------------------------------------

def _matmul_kernel_single(x_ref, w_ref, o_ref):
    # Gridless single-tile path: one MXU matmul over the whole (small) problem.
    o_ref[...] = jnp.dot(
        x_ref[...], w_ref[...], preferred_element_type=jnp.float32
    ).astype(o_ref.dtype)


def _matmul_kernel_inplace(x_ref, w_ref, o_ref):
    # o_ref block is resident across the k axis (its index_map ignores k) and
    # is already f32, so accumulate directly into it: no scratch, no finalize.
    @pl.when(pl.program_id(2) == 0)
    def _():
        o_ref[...] = jnp.zeros_like(o_ref)

    o_ref[...] += jnp.dot(x_ref[...], w_ref[...],
                          preferred_element_type=jnp.float32)


def _matmul_kernel_acc(x_ref, w_ref, o_ref, acc_ref):
    # Narrow output dtypes keep an f32 VMEM accumulator for precision.
    @pl.when(pl.program_id(2) == 0)
    def _():
        acc_ref[...] = jnp.zeros_like(acc_ref)

    acc_ref[...] += jnp.dot(x_ref[...], w_ref[...],
                            preferred_element_type=jnp.float32)

    @pl.when(pl.program_id(2) == pl.num_programs(2) - 1)
    def _():
        o_ref[...] = acc_ref[...].astype(o_ref.dtype)


# ---------------------------------------------------------------------------
# Wrapper
# ---------------------------------------------------------------------------

@functools.partial(
    jax.jit,
    static_argnames=("n_out", "tm_cap", "tn_cap", "tk_cap",
                     "n_gran", "k_gran", "vmem_limit", "two_cores"),
)
def _linear_2d(x2, w_t, *, n_out, tm_cap, tn_cap, tk_cap,
               n_gran, k_gran, vmem_limit, two_cores):
    """x2: (M, K) activations.  w_t: (Kp, Np) pre-transposed (pre-padded) weight.
    Returns (M, n_out) = x2 @ W.T."""
    M, K = x2.shape
    Kp, Np = w_t.shape
    itemsize = x2.dtype.itemsize

    # ---- Fast path: whole problem fits one tile -> no grid / pad / slice. ----
    if M <= tm_cap and Kp <= tk_cap and Np <= tn_cap and Kp == K and Np == n_out:
        return pl.pallas_call(
            _matmul_kernel_single,
            out_shape=jax.ShapeDtypeStruct((M, n_out), x2.dtype),
            compiler_params=pltpu.CompilerParams(vmem_limit_bytes=vmem_limit),
            cost_estimate=pl.CostEstimate(
                flops=2 * M * n_out * K,
                transcendentals=0,
                bytes_accessed=itemsize * (M * K + K * n_out + M * n_out),
            ),
        )(x2, w_t)

    # ---- Tiled path. ----
    tm = _balanced_tile(M, tm_cap, 8, 8)
    tk = _balanced_tile(K, tk_cap, 128, k_gran)
    tn = _balanced_tile(n_out, tn_cap, 128, n_gran)

    Mp = M if tm == M else _round_up(M, tm)
    # Weight was padded once at prep time with the same deterministic rule.
    assert Kp == (K if tk == K else _round_up(K, tk))
    assert Np == (n_out if tn == n_out else _round_up(n_out, tn))

    # v7x: ensure a 'parallel' axis has >=2 blocks so both TensorCores get work
    # (only when it costs no extra padding).
    if (two_cores and Mp // tm == 1 and Np // tn == 1
            and tn == Np and Np % 256 == 0):
        tn = Np // 2

    x2p = x2
    if (Mp, Kp) != (M, K):
        x2p = jnp.pad(x2, ((0, Mp - M), (0, Kp - K)))

    grid = (Mp // tm, Np // tn, Kp // tk)

    out_dtype = x2.dtype
    use_inplace = out_dtype == jnp.float32
    kernel = _matmul_kernel_inplace if use_inplace else _matmul_kernel_acc
    scratch = [] if use_inplace else [pltpu.VMEM((tm, tn), jnp.float32)]

    out = pl.pallas_call(
        kernel,
        out_shape=jax.ShapeDtypeStruct((Mp, Np), out_dtype),
        grid=grid,
        in_specs=[
            pl.BlockSpec((tm, tk), lambda i, j, k: (i, k)),
            pl.BlockSpec((tk, tn), lambda i, j, k: (k, j)),
        ],
        out_specs=pl.BlockSpec((tm, tn), lambda i, j, k: (i, j)),
        scratch_shapes=scratch,
        compiler_params=pltpu.CompilerParams(
            dimension_semantics=("parallel", "parallel", "arbitrary"),
            vmem_limit_bytes=vmem_limit,
        ),
        cost_estimate=pl.CostEstimate(
            flops=2 * Mp * Np * Kp,
            transcendentals=0,
            bytes_accessed=itemsize * (Mp * Kp + Kp * Np + Mp * Np),
        ),
    )(x2p, w_t)

    if (Mp, Np) != (M, n_out):
        out = out[:M, :n_out]
    return out


class PallasLinear:
    """Bias-free linear y = x @ W.T, W in PyTorch (out, in) layout.

    The weight is transposed to (K, N) and, only if K/N must be tiled,
    zero-padded to the tile grid ONCE at construction time.
    """

    def __init__(self, weight):
        self.out_features, self.in_features = weight.shape
        self._cfg = _device_config()
        K, N = self.in_features, self.out_features
        cfg = self._cfg
        tk = _balanced_tile(K, cfg["tk_cap"], 128, cfg["k_gran"])
        tn = _balanced_tile(N, cfg["tn_cap"], 128, cfg["n_gran"])
        Kp = K if tk == K else _round_up(K, tk)
        Np = N if tn == N else _round_up(N, tn)
        w_t = jnp.asarray(weight).T  # (K, N): contraction on dim 0, no per-tile transpose
        if (Kp, Np) != (K, N):
            w_t = jnp.pad(w_t, ((0, Kp - K), (0, Np - N)))
        self.w_t = w_t

    def __call__(self, x):
        orig_shape = x.shape
        K = orig_shape[-1]
        assert K == self.in_features, "hidden dim mismatch"
        x2 = x.reshape(-1, K)
        out = _linear_2d(x2, self.w_t, n_out=self.out_features, **self._cfg)
        return out.reshape(*orig_shape[:-1], self.out_features)


class Model:
    """Pallas port of the PyTorch Model: one bias-free nn.Linear applied once."""

    def __init__(self, weight):
        self.linear = PallasLinear(weight)

    def __call__(self, x):
        for _ in range(1):  # mirrors the PyTorch forward loop
            x = self.linear(x)
        return x


if __name__ == "__main__":
    hidden_size = 32
    output_size = 64
    batch = 8

    key = jax.random.PRNGKey(0)
    kx, kw = jax.random.split(key)

    # Deterministic init mimicking nn.Linear's uniform(-1/sqrt(K), 1/sqrt(K)).
    bound = 1.0 / (hidden_size ** 0.5)
    weight = jax.random.uniform(
        kw, (output_size, hidden_size), dtype=jnp.float32,
        minval=-bound, maxval=bound,
    )
    x = jax.random.normal(kx, (batch, hidden_size), dtype=jnp.float32)

    model = Model(weight)
    y = model(x)
    y = jax.block_until_ready(y)

    # Reference check against plain JAX.
    y_ref = x @ weight.T
    assert y.shape == (batch, output_size)
    assert jnp.allclose(y, y_ref, atol=1e-5, rtol=1e-5)

    print("KERNEL_OK")
</pallas_src>

<mosaic_0001>
module attributes {stable_mosaic.version = 11 : i64} {
  func.func @_matmul_kernel_single(%arg0: memref<8x32xf32, #tpu.memory_space<vmem>>, %arg1: memref<32x64xf32, #tpu.memory_space<vmem>>, %arg2: memref<8x64xf32, #tpu.memory_space<vmem>>) attributes {dimension_semantics = [], scalar_prefetch = 0 : i64, scratch_operands = 0 : i64, tpu.core_type = #tpu.core_type<tc>} {
    %c0 = arith.constant 0 : index
    %c0_0 = arith.constant 0 : index
    %0 = vector.load %arg0[%c0, %c0_0] : memref<8x32xf32, #tpu.memory_space<vmem>>, vector<8x32xf32>
    %c0_1 = arith.constant 0 : index
    %c0_2 = arith.constant 0 : index
    %1 = vector.load %arg1[%c0_1, %c0_2] : memref<32x64xf32, #tpu.memory_space<vmem>>, vector<32x64xf32>
    %cst = arith.constant dense<0.000000e+00> : vector<8x64xf32>
    %2 = tpu.matmul %0, %1, %cst {dimension_numbers = #tpu.dot_dimension_numbers<[1], [0], [0], [1], [0, 0, 1, 1], [], []>} : vector<8x32xf32>, vector<32x64xf32>, vector<8x64xf32> -> vector<8x64xf32>
    %c0_3 = arith.constant 0 : index
    %c0_4 = arith.constant 0 : index
    %3 = vector.load %arg2[%c0_3, %c0_4] : memref<8x64xf32, #tpu.memory_space<vmem>>, vector<8x64xf32>
    tpu.vector_store %arg2[%c0_3, %c0_4], %2 {strides = array<i32>} : memref<8x64xf32, #tpu.memory_space<vmem>>, vector<8x64xf32>,
    return
  }
}

</mosaic_0001>

<bundles_post_ra>
// kernel: _linear_2d.1
= control target key start
LH: loop header
LB: loop body
LE: loop exit
PB: predicated region body
PF: predicated region fallthrough
CT: control target
= control target key end

     0   :  { %7 = vsyncpa [#allocation3], 0  ;;  %s304_s0 = inlined_call_operand.hbm [shape: f32[8,32], index: 0, kind: input, shape index: {}]   ;;  %s305_s1 = inlined_call_operand.hbm [shape: f32[32,64], index: 1, kind: input, shape index: {}]   ;;  %s306_s2 = inlined_call_operand.hbm [shape: f32[8,64], index: 2, kind: output, shape index: {}]  }
   0x1   :  { %8 = vsyncpa [#allocation6], 0 }
   0x2   :  { %9 = vsyncpa [#allocation4], 0  ;;  %s238_s9 = smov [#allocation2]   ;;  %s239_s11 = smov [#allocation5]  }
   0x3   :  { %s16_s10 = sshll.u32 %s238_s9, 4  ;;  %s25_s12 = sshll.u32 %s239_s11, 4  ;;  %s17_s10 = int_to_ptr.vmem [resolvable:$true] %s16_s10  ;;  %s261_s12 = int_to_ptr.vmem [resolvable:$true] %s25_s12 }
   0x4   :  { %s166_s15 = scalar_lea.hbm %s304_s0, 128 }
   0x5   :  { %p167_p0 = scmp.ne.s32.totalorder %s304_s0, %s166_s15  ;;  %p170_p1 = scmp.lt.u32.totalorder %s166_s15, %s304_s0 }
   0x7   :  { %p172_p2 = pnand %p170_p1, %p167_p0 }
   0x9   :  { %175 = shalt.err (!%p172_p2)
}
   0xa   :  { %s176_s20 = scalar_lea.vmem %s17_s10, 128  ;;  %p181_p4 = scmp.lt.s32.totalorder %s17_s10, %s17_s10 }
   0xb   :  { %p177_p3 = scmp.ne.s32.totalorder %s17_s10, %s176_s20  ;;  %p182_p5 = scmp.lt.s32.totalorder %s176_s20, %s176_s20 }
   0xd   :  { %p183_p6 = por %p182_p5, %p181_p4 }
   0xf   :  { %p184_p7 = pnand %p183_p6, %p177_p3 }
  0x11   :  { %187 = shalt.err (!%p184_p7)
}
  0x12   :  { %19 = dma.hbm_to_vmem [thread:$0]  %s304_s0, 128, %s17_s10, [#allocation3]  }
  0x13   :  { %s188_s25 = scalar_lea.hbm %s305_s1, 512 }
  0x14   :  { %p189_p8 = scmp.ne.s32.totalorder %s305_s1, %s188_s25  ;;  %p192_p9 = scmp.lt.u32.totalorder %s188_s25, %s305_s1 }
  0x16   :  { %p194_p10 = pnand %p192_p9, %p189_p8 }
  0x18   :  { %197 = shalt.err (!%p194_p10)
}
  0x19   :  { %s198_s30 = scalar_lea.vmem %s261_s12, 512  ;;  %p203_p12 = scmp.lt.s32.totalorder %s261_s12, %s261_s12 }
  0x1a   :  { %p199_p11 = scmp.ne.s32.totalorder %s261_s12, %s198_s30  ;;  %p204_p13 = scmp.lt.s32.totalorder %s198_s30, %s198_s30 }
  0x1c   :  { %p205_p0 = por %p204_p13, %p203_p12 }
  0x1e   :  { %p206_p1 = pnand %p205_p0, %p199_p11 }
  0x20   :  { %209 = shalt.err (!%p206_p1)
}
  0x21   :  { %s240_s0 = smov 128   ;;  %s241_s3 = smov 8  }
  0x22   :  { %31 = dma.hbm_to_vmem [thread:$0]  %s305_s1, 512, %s261_s12, [#allocation6], %s240_s0, %s240_s0, %s241_s3  }
  0x23   :  { %232 = dma.done.wait [#allocation3], 128  }
  0x24   :  { %233 = vsyncadd [#allocation3], 4294967168 }
  0x25   :  { %234 = dma.done.wait [#allocation6], 512  }
  0x26   :  { %235 = vsyncadd [#allocation6], 4294966784  ;;  %v242_v0 = vmov 0.0|0.0   ;;  %vm243_vm0 = vmmov 0   ;;  %v244_v1 = vmov 0.0   ;;  %v39_v2 = vld [vmem:[#allocation5] sm:$0xff] }
  0x27   :  { %152 = vmatprep.subr.bf16.mxu0 %v242_v0  ;;  %149 = vmatprep.mubr.msk.f32.mxu0 %vm243_vm0, %v244_v1  ;;  %v40_v3 = vld [vmem:[#allocation5 + $0x8] sm:$0xff]  ;;  %v41_v4 = vld [vmem:[#allocation5 + $0x10] sm:$0xff]  ;;  %v42_v6 = vld [vmem:[#allocation5 + $0x18] sm:$0xff]  ;;  %vm43_vm1 = vcmask 261120   ;;  %s245_s1 = smov [#allocation7]   ;;  %vm117_vm2 = vcmask 523264  }
  0x28   :  { %v153_v5 = vpack.c.bf16 %v40_v3, %v39_v2  ;;  %v156_v7 = vpack.c.bf16 %v42_v6, %v41_v4  ;;  %v38_v8 = vld [vmem:[#allocation2] sm:$0xff]  ;;  %s125_s6 = sshll.u32 %s245_s1, 4  ;;  %s126_s6 = int_to_ptr.vmem [resolvable:$true] %s125_s6 }
  0x29   :  { %s210_s7 = scalar_lea.vmem %s126_s6, 128  ;;  %p215_p3 = scmp.lt.s32.totalorder %s126_s6, %s126_s6 }
  0x2a   :  { %154 = vmatpush3.bf16.msra.mxu0 %v153_v5  ;;  %p211_p2 = scmp.ne.s32.totalorder %s126_s6, %s210_s7  ;;  %p216_p4 = scmp.lt.s32.totalorder %s210_s7, %s210_s7 }
  0x2b   :  { %155 = vmatprep.subr.bf16.mxu0 %v242_v0 }
  0x2c   :  { %p217_p5 = por %p216_p4, %p215_p3 }
  0x2e   :  { %157 = vmatpush3.bf16.msra.mxu0 %v156_v7  ;;  %p218_p6 = pnand %p217_p5, %p211_p2 }
  0x31   :  { %150 = vmatmul.mubr.msk.f32.vlgmr.msra.gmra.mrb[0].mxu0 %vm43_vm1, %v38_v8 }
 0x104   :  { %v113_v9 = vpop.f32.mrb[0].mxu0 }
 0x105   :  { %v151_v10 = vpop.f32.mrb[1].mxu0  ;;  %118 = vst.msk [vmem:[#allocation7] sm:$0xff] %vm117_vm2, %v113_v9 }
 0x106   :  { %221 = shalt.err (!%p218_p6)
}
 0x107   :  { %s222_s10 = scalar_lea.hbm %s306_s2, 128 }
 0x108   :  { %p223_p7 = scmp.ne.s32.totalorder %s306_s2, %s222_s10  ;;  %p226_p8 = scmp.lt.u32.totalorder %s222_s10, %s306_s2 }
 0x10a   :  { %p228_p9 = pnand %p226_p8, %p223_p7 }
 0x10c   :  { %231 = shalt.err (!%p228_p9)
}
 0x10d   :  { %128 = dma.vmem_to_hbm [thread:$0]  %s126_s6, 128, %s306_s2, [#allocation4]  }
 0x10e   :  { %236 = dma.done.wait [#allocation4], 128  }
 0x10f   :  { %237 = vsyncadd [#allocation4], 4294967168 }
 0x110   :  { %132 = vsyncpa [#allocation3], 1 }
 0x111   :  { %133 = vsyncpa [#allocation6], 1 }
 0x112   :  { %134 = vsyncpa [#allocation4], 1 }

</bundles_post_ra>
